<compile_context>
chip_gen: v6e
topology: v6e:2x2x1
jax: 0.10.0
libtpu: 0.0.40
codegen_flags: <defaults>
</compile_context>

<pallas_src>
import functools
import math
import re

import jax
import jax.numpy as jnp
from jax import lax
from jax.experimental import pallas as pl
from jax.experimental.pallas import tpu as pltpu


# --------------------------------------------------------------------------- #
# Kernel: one lane-dense MXU matmul per grid step, fused bias + ReLU.
# --------------------------------------------------------------------------- #
def _matmul_bias_relu_kernel(x_ref, w_ref, b_ref, o_ref):
    # x_ref: (K_pad, col_tile)   bf16 im2col'd patches (col_tile % 128 == 0)
    # w_ref: (C_out, K_pad)      bf16 reshaped conv weights (resident)
    # b_ref: (C_out, 1)          f32 bias
    # o_ref: (C_out, col_tile)   output tile (lane-dense, unmasked stores)
    acc = lax.dot_general(
        w_ref[...], x_ref[...],
        dimension_numbers=(((1,), (0,)), ((), ())),
        preferred_element_type=jnp.float32,
    )
    o_ref[...] = jnp.maximum(acc + b_ref[...], 0.0).astype(o_ref.dtype)


def _cdiv(a, b):
    return -(-a // b)


def _tpu_info():
    """(vmem_capacity_bytes, has_two_tensorcores). Best effort, safe fallbacks."""
    vmem_cap = 64 << 20          # conservative default: v7x per-TC VMEM
    two_tc = False
    try:
        vmem_cap = int(pltpu.get_tpu_info().vmem_capacity_bytes)
    except Exception:
        pass
    try:
        kind = jax.devices()[0].device_kind
        m = re.search(r"(\d+)", kind)
        if m:
            gen = int(m.group(1))
            two_tc = (gen == 4) or (gen >= 7)  # megacore: 2 TCs per device
    except Exception:
        pass
    return vmem_cap, two_tc


def _choose_col_tiling(cols, k_pad, c_out, out_itemsize, vmem_cap, want_even):
    """Pick a lane-dense column tile from a VMEM budget.

    No divisibility constraint on the original column count: columns are
    padded up to a multiple of the chosen tile, so an awkward factorization
    never degrades the tile to 128.
    """
    cols128 = _cdiv(cols, 128) * 128
    # VMEM bytes per streamed column: double-buffered bf16 input + output rows.
    per_col = 2 * (k_pad * 2 + c_out * out_itemsize)
    budget = min(max(vmem_cap // 4, 4 << 20), 8 << 20)
    tile = max(128, min((budget // per_col) // 128 * 128, cols128))
    blocks = _cdiv(cols128, tile)
    if want_even and blocks % 2 == 1 and cols128 >= 256:
        # Best-effort: prefer an even column-block count so a 2-TC (megacore)
        # chip keeps both TensorCores busy on the last step.
        t2 = _cdiv(_cdiv(cols128, blocks + 1), 128) * 128
        b2 = _cdiv(cols128, t2)
        if b2 % 2 == 0:
            tile, blocks = t2, b2
    return tile, blocks


@functools.partial(jax.jit, static_argnames=("stride", "padding"))
def slim_conv2d(x, weight, bias, *, stride, padding):
    """x: (N, C_in, H, W) NCHW; weight: (C_out, C_in, KH, KW) OIHW; bias: (C_out,)."""
    if isinstance(stride, int):
        stride = (stride, stride)
    if isinstance(padding, int):
        padding = (padding, padding)

    n, c_in, h, w = x.shape
    c_out, _, kh, kw = weight.shape
    ph, pw = padding
    sh, sw = stride

    # --- Wrapper glue: zero-pad (== nn.ZeroPad2d) ----------------------------
    x_pad = jnp.pad(x, ((0, 0), (0, 0), (ph, ph), (pw, pw)))
    hp, wp = h + 2 * ph, w + 2 * pw
    oh = (hp - kh) // sh + 1
    ow = (wp - kw) // sw + 1

    # --- Wrapper glue: im2col with NO transpose of the expanded buffer -------
    # Taps are stacked directly as (N, C_in, KH*KW, OH, OW); the reshape below
    # only merges adjacent axes, so the KH*KW-amplified buffer is never
    # transposed in HBM. Row index = ci*(KH*KW) + i*KW + j, matching
    # weight.reshape(C_out, C_in*KH*KW) (OIHW order). Stride handled here.
    # TODO(synk): for production shapes, fold the im2col into the kernel (halo
    # row-tiles of x_pad + KH*KW accumulated matmuls with pl.when init) to
    # remove the KH*KW x HBM amplification of this buffer entirely.
    taps = []
    for i in range(kh):
        for j in range(kw):
            taps.append(
                lax.slice(
                    x_pad,
                    (0, 0, i, j),
                    (n, c_in, i + (oh - 1) * sh + 1, j + (ow - 1) * sw + 1),
                    (1, 1, sh, sw),
                )  # (N, C_in, OH, OW)
            )
    k_dim = c_in * kh * kw
    cols = oh * ow
    patches = jnp.stack(taps, axis=2)            # (N, C_in, KH*KW, OH, OW)
    patches = patches.reshape(n, k_dim, cols)    # adjacent-axis merges only

    # --- bf16 operands for the MXU (f32 accumulation inside the kernel) ------
    patches = patches.astype(jnp.bfloat16)
    w2d = weight.reshape(c_out, k_dim).astype(jnp.bfloat16)
    b2d = bias.reshape(c_out, 1).astype(jnp.float32)

    # --- K padded to a multiple of 16 (bf16 sublane packing): clean full vld -
    k_pad = _cdiv(k_dim, 16) * 16
    if k_pad != k_dim:
        patches = jnp.pad(patches, ((0, 0), (0, k_pad - k_dim), (0, 0)))
        w2d = jnp.pad(w2d, ((0, 0), (0, k_pad - k_dim)))

    # --- Column tiling from a per-generation VMEM budget ---------------------
    out_dtype = x.dtype
    out_itemsize = jnp.dtype(out_dtype).itemsize
    vmem_cap, two_tc = _tpu_info()
    want_even = two_tc and (n % 2 == 1)   # even batch already balances 2 TCs
    col_tile, col_blocks = _choose_col_tiling(
        cols, k_pad, c_out, out_itemsize, vmem_cap, want_even)
    cols_pad = col_tile * col_blocks
    if cols_pad != cols:
        patches = jnp.pad(patches, ((0, 0), (0, 0), (0, cols_pad - cols)))

    est_vmem = (2 * col_tile * (k_pad * 2 + c_out * out_itemsize)
                + 2 * c_out * (k_pad * 2 + 4))
    vmem_limit = int(min(max(32 << 20, 2 * est_vmem),
                         max(vmem_cap * 3 // 4, 16 << 20)))

    cost = pl.CostEstimate(
        flops=2 * n * c_out * k_pad * cols_pad,
        transcendentals=0,
        bytes_accessed=(patches.size * 2 + w2d.size * 2 + b2d.size * 4
                        + n * c_out * cols_pad * out_itemsize),
    )

    out3d = pl.pallas_call(
        _matmul_bias_relu_kernel,
        out_shape=jax.ShapeDtypeStruct((n, c_out, cols_pad), out_dtype),
        grid_spec=pltpu.PrefetchScalarGridSpec(
            num_scalar_prefetch=0,
            grid=(n, col_blocks),
            in_specs=[
                # Batch dim squeezed out of the kernel view (size-1 block).
                pl.BlockSpec((None, k_pad, col_tile), lambda b, j: (b, 0, j)),
                pl.BlockSpec((c_out, k_pad), lambda b, j: (0, 0)),
                pl.BlockSpec((c_out, 1), lambda b, j: (0, 0)),
            ],
            out_specs=pl.BlockSpec((None, c_out, col_tile), lambda b, j: (b, 0, j)),
        ),
        compiler_params=pltpu.CompilerParams(
            dimension_semantics=("parallel", "parallel"),
            vmem_limit_bytes=vmem_limit,
        ),
        cost_estimate=cost,
    )(patches, w2d, b2d)

    # Padded tail columns hold ReLU(bias); slice them off before un-flattening.
    # Output is already in NCHW order (no post-kernel transpose needed).
    out = out3d[:, :, :cols].reshape(n, c_out, oh, ow)
    return out


def _xavier_uniform(key, shape):
    # nn.init.xavier_uniform_ on Conv2d weight (C_out, C_in, KH, KW)
    c_out, c_in, kh, kw = shape
    fan_in = c_in * kh * kw
    fan_out = c_out * kh * kw
    a = math.sqrt(6.0 / (fan_in + fan_out))
    return jax.random.uniform(key, shape, jnp.float32, minval=-a, maxval=a)


if __name__ == "__main__":
    # SlimConv2d(in_channels=4, out_channels=8, kernel=3, stride=1, padding=1)
    in_channels, out_channels = 4, 8
    kernel_size, stride, padding = 3, 1, 1
    bias_init = 0.0

    key = jax.random.PRNGKey(0)
    kx, kw_key = jax.random.split(key)

    x = jax.random.normal(kx, (2, in_channels, 16, 16), jnp.float32)
    weight = _xavier_uniform(
        kw_key, (out_channels, in_channels, kernel_size, kernel_size))
    bias = jnp.full((out_channels,), bias_init, jnp.float32)

    out = slim_conv2d(x, weight, bias, stride=stride, padding=padding)
    out = jax.block_until_ready(out)

    # Reference (ZeroPad2d + Conv2d + ReLU). Operands cast to bf16 to match the
    # kernel's MXU input precision (accumulation stays f32 in both paths).
    xb = x.astype(jnp.bfloat16).astype(jnp.float32)
    wb = weight.astype(jnp.bfloat16).astype(jnp.float32)
    ref = lax.conv_general_dilated(
        xb, wb, window_strides=(stride, stride),
        padding=((padding, padding), (padding, padding)),
        dimension_numbers=("NCHW", "OIHW", "NCHW"),
    ) + bias[None, :, None, None]
    ref = jnp.maximum(ref, 0.0)
    assert out.shape == ref.shape
    assert jnp.allclose(out, ref, atol=1e-3, rtol=1e-3)

    print("KERNEL_OK")
</pallas_src>

<mosaic_0001>
module attributes {stable_mosaic.version = 11 : i64} {
  func.func @_matmul_bias_relu_kernel(%arg0: i32, %arg1: i32, %arg2: memref<1x48x256xbf16, #tpu.memory_space<vmem>>, %arg3: memref<8x48xbf16, #tpu.memory_space<vmem>>, %arg4: memref<8x1xf32, #tpu.memory_space<vmem>>, %arg5: memref<1x8x256xf32, #tpu.memory_space<vmem>>) attributes {dimension_semantics = [#tpu.dimension_semantics<parallel>, #tpu.dimension_semantics<parallel>], iteration_bounds = array<i64: 2, 1>, scalar_prefetch = 0 : i64, scratch_operands = 0 : i64, tpu.core_type = #tpu.core_type<tc>, window_params = [{transform_indices = @transform_0, window_bounds = array<i64: 1, 48, 256>}, {pipeline_mode = #tpu.pipeline_mode<synchronous>, transform_indices = @transform_1, window_bounds = array<i64: 8, 48>}, {pipeline_mode = #tpu.pipeline_mode<synchronous>, transform_indices = @transform_2, window_bounds = array<i64: 8, 1>}, {transform_indices = @transform_3, window_bounds = array<i64: 1, 8, 256>}]} {
    %c0 = arith.constant 0 : index
    %c0_0 = arith.constant 0 : index
    %0 = vector.load %arg3[%c0, %c0_0] : memref<8x48xbf16, #tpu.memory_space<vmem>>, vector<8x48xbf16>
    %c0_1 = arith.constant 0 : index
    %c0_2 = arith.constant 0 : index
    %c0_3 = arith.constant 0 : index
    %1 = vector.load %arg2[%c0_1, %c0_2, %c0_3] : memref<1x48x256xbf16, #tpu.memory_space<vmem>>, vector<1x48x256xbf16>
    %2 = vector.shape_cast %1 : vector<1x48x256xbf16> to vector<48x256xbf16>
    %cst = arith.constant dense<0.000000e+00> : vector<8x256xf32>
    %3 = tpu.matmul %0, %2, %cst {dimension_numbers = #tpu.dot_dimension_numbers<[1], [0], [0], [1], [0, 0, 1, 1], [], []>} : vector<8x48xbf16>, vector<48x256xbf16>, vector<8x256xf32> -> vector<8x256xf32>
    %c0_4 = arith.constant 0 : index
    %c0_5 = arith.constant 0 : index
    %4 = vector.load %arg4[%c0_4, %c0_5] : memref<8x1xf32, #tpu.memory_space<vmem>>, vector<8x1xf32>
    %5 = vector.broadcast %4 : vector<8x1xf32> to vector<8x256xf32>
    %6 = arith.addf %3, %5 : vector<8x256xf32>
    %cst_6 = arith.constant 0.000000e+00 : f32
    %7 = vector.broadcast %cst_6 : f32 to vector<8x256xf32>
    %8 = arith.maximumf %6, %7 : vector<8x256xf32>
    %c0_7 = arith.constant 0 : index
    %c0_8 = arith.constant 0 : index
    %c0_9 = arith.constant 0 : index
    %9 = vector.load %arg5[%c0_7, %c0_8, %c0_9] : memref<1x8x256xf32, #tpu.memory_space<vmem>>, vector<1x8x256xf32>
    %10 = vector.shape_cast %9 : vector<1x8x256xf32> to vector<8x256xf32>
    %11 = vector.shape_cast %8 : vector<8x256xf32> to vector<1x8x256xf32>
    tpu.vector_store %arg5[%c0_7, %c0_8, %c0_9], %11 {strides = array<i32>} : memref<1x8x256xf32, #tpu.memory_space<vmem>>, vector<1x8x256xf32>,
    return
  }
  func.func @transform_0(%arg0: i32, %arg1: i32) -> (i32, i32, i32) {
    %c0_i32 = arith.constant 0 : i32
    %c0_i32_0 = arith.constant 0 : i32
    return %arg0, %c0_i32, %arg1 : i32, i32, i32
  }
  func.func @transform_1(%arg0: i32, %arg1: i32) -> (i32, i32) {
    %c0_i32 = arith.constant 0 : i32
    %c0_i32_0 = arith.constant 0 : i32
    %c0_i32_1 = arith.constant 0 : i32
    return %c0_i32, %c0_i32_0 : i32, i32
  }
  func.func @transform_2(%arg0: i32, %arg1: i32) -> (i32, i32) {
    %c0_i32 = arith.constant 0 : i32
    %c0_i32_0 = arith.constant 0 : i32
    %c0_i32_1 = arith.constant 0 : i32
    return %c0_i32, %c0_i32_0 : i32, i32
  }
  func.func @transform_3(%arg0: i32, %arg1: i32) -> (i32, i32, i32) {
    %c0_i32 = arith.constant 0 : i32
    %c0_i32_0 = arith.constant 0 : i32
    return %arg0, %c0_i32, %arg1 : i32, i32, i32
  }
}

</mosaic_0001>

<bundles_post_ra>
// kernel: slim_conv2d.1
= control target key start
LH: loop header
LB: loop body
LE: loop exit
PB: predicated region body
PF: predicated region fallthrough
CT: control target
= control target key end

     0   :  { %s489_s12 = smov 0   ;;  %s491_s13 = smov 0   ;;  %s528_s0 = inlined_call_operand.vmem [shape: bf16[2,48,256], index: 0, kind: input, shape index: {}]   ;;  %s529_s1 = inlined_call_operand.vmem [shape: bf16[8,48], index: 1, kind: input, shape index: {}]   ;;  %s530_s2 = inlined_call_operand.vmem [shape: f32[8,1], index: 2, kind: input, shape index: {}]   ;;  %s531_s3 = inlined_call_operand.vmem [shape: f32[2,8,256], index: 3, kind: output, shape index: {}]  }
   0x1   :  { %s493_s14 = smov 0  }
   0x2 LB: > { %s25_s15 = sadd.s32 1, %s462_s13  ;;  %p394_p0 = scmp.ge.s32.totalorder %s466_s14, 1  ;;  %s466_s14 = sphi %s493_s14, %s13_s14   ;;  %s462_s13 = sphi %s491_s13, %s533_s13   ;;  %s458_s12 = sphi %s489_s12, %s532_s12  }
   0x3   : > { %p27_p1 = scmp.ge.s32.totalorder %s25_s15, 2  ;;  %p158_p2 = scmp.lt.s32.totalorder %s466_s14, 3 }
   0x5   : > { %s535_s15 = smov (%p27_p1, %s25_s15), 0  ;;  %p159_p3 = pnand %p394_p0, %p158_p2 }
   0x6   : > { %p191_p4 = scmp.lt.s32.totalorder (!%p159_p3), %s458_s12, 1 }
   0x7   : > { %162 = sbr.rel (%p159_p3) target bundleno = 229 (0xe5), region = 32 }
   0xc   : > { %v218_v0 = vld [vmem:[%s530_s2] sm:$0xff]  ;;  %v468_v1 = vmov 0   ;;  %s537_s12 = smov (!%p191_p4, %s458_s12), 1  ;;  %vm254_vm0 = vcmask 392192  }
   0xd   : > { %290 = vmatprep.mubr.bf16.mxu0 %v468_v1  ;;  %434 = vset.pattern.permute.xlu0 %v468_v1  ;;  %s408_s18 = smul.u32 48, %s537_s12  ;;  %v211_v8 = vld [vmem:[%s529_s1] sm:$0xf]  ;;  %s407_s24 = sshll.u32 %s537_s12, 4 }
   0xe   : > { %221 = vperm.xlu0 %434, %v218_v0   ;;  %s208_s27 = scalar_lea.vmem %s531_s3, %s407_s24 }
   0xf   : > { %s198_s21 = scalar_lea.vmem %s528_s0, %s408_s18 }
  0x10   : > { %v435_v2 = vld [vmem:[%s198_s21 + $0x24] ss:$8 sps:$4 sm:$0xff]   ;;  %v437_v3 = vld [vmem:[%s198_s21 + $0x20] ss:$8 sps:$4 sm:$0xff]   ;;  %v438_v4 = vld [vmem:[%s198_s21 + $0x14] ss:$8 sps:$4 sm:$0xff]  }
  0x11   : > { %268 = vmatprep.subr.bf16.mxu0 %v435_v2  ;;  %v440_v5 = vld [vmem:[%s198_s21 + $0x10] ss:$8 sps:$4 sm:$0xff]   ;;  %v441_v6 = vld [vmem:[%s198_s21 + $0x4] ss:$8 sps:$4 sm:$0xff]   ;;  %v443_v7 = vld [vmem:[%s198_s21] ss:$8 sps:$4 sm:$0xff]  }
  0x12   : > { %269 = vmatpush1.bf16.msra.mxu0 %v437_v3 }
  0x13   : > { %270 = vmatprep.subr.bf16.mxu0 %v438_v4 }
  0x16   : > { %271 = vmatpush1.bf16.msra.mxu0 %v440_v5 }
  0x17   : > { %272 = vmatprep.subr.bf16.mxu0 %v441_v6 }
  0x1a   : > { %273 = vmatpush1.bf16.msra.mxu0 %v443_v7 }
  0x1d   : > { %404 = vmatmul.mubr.msk.bf16.vlgmr.msra.gmra.mxu0 %vm254_vm0, %v211_v8 }
  0x89   : > { %v222_v9 = vpop.permute.xlu0 %221 }
  0xdd   : > { %v292_v10 = vpop.f32.mrf.mxu0 }
  0xde   : > { %v293_v11 = vadd.f32 %v292_v10, %v222_v9 }
  0xdf   : > { %v294_v12 = vpop.f32.mrf.mxu0 }
  0xe0   : > { %v299_v13 = vmax.f32 %v293_v11, 0.0  ;;  %v295_v14 = vadd.f32 %v294_v12, %v222_v9 }
  0xe1   : > { %v296_v15 = vpop.f32.mrf.mxu0 }
  0xe2   : > { %301 = vst [vmem:[%s208_s27] sm:$0xff] %v299_v13  ;;  %v300_v16 = vmax.f32 %v295_v14, 0.0 }
  0xe3   : > { %v297_v17 = vpop.f32.mrf.mxu0 }
  0xe4   : > { %302 = vst [vmem:[%s208_s27 + $0x8] sm:$0xff] %v300_v16 }
  0xe5 PF: > { %s13_s14 = sadd.s32 1, %s466_s14   ;;  %s532_s12 = smov %s462_s13 }
  0xe6   : > { %p10_p5 = scmp.ge.s32.totalorder %s13_s14, 4   ;;  %s533_s13 = smov %s535_s15 }
  0xe8   :  { %12 = sbr.rel (!%p10_p5) target bundleno = 2 (0x2), region = 62 }

</bundles_post_ra>
